<compile_context>
chip_gen: v6e
topology: v6e:2x2x1
jax: 0.10.0
libtpu: 0.0.40
codegen_flags: <defaults>
</compile_context>

<pallas_src>
import functools

import jax
import jax.numpy as jnp
from jax import lax
from jax.experimental import pallas as pl
from jax.experimental.pallas import tpu as pltpu


HEAD_PAD = 128                          # fused head output padded to one lane tile: [risk|event|cancer|0]
DEFAULT_TILE_N = 2048                   # instance-axis tile (multiple of 128); per-gen tunable
VMEM_LIMIT_BYTES = 48 * 1024 * 1024     # > 16/32 MiB defaults, < v7x's 64 MiB physical VMEM


def _abmil_kernel(h_ref, w_ref, v_ref, out_ref, scores_ref,
                  m_sc, l_sc, z_sc, *, L, HP, n_valid, n_pad, tile_n):
    """Grid = (bag, n_tile).  Processes one (TILE_N, M) tile of one bag per step.

    h_ref      : (1, TILE_N, M)     instance-feature tile (bf16 or f32)
    w_ref      : (M, HP + L)        weight slab: [:, :HP] = padded fused-head W, [:, HP:] = w1
    v_ref      : (8, HP) f32        row 0 = padded fused-head biases, row 1[:L] = b1, row 2[:L] = w2
    out_ref    : (1, 1, HP) f32     fused head logits (written once, at the last n-tile)
    scores_ref : (1, 1, TILE_N) f32 raw attention scores of this tile (padded lanes = -1e30)
    m_sc, l_sc : (1, 1) f32         online-softmax running max / denominator
    z_sc       : (1, M) f32         running unnormalized attention-pooled features
    """
    k = pl.program_id(1)

    @pl.when(k == 0)
    def _init():
        m_sc[...] = jnp.full_like(m_sc, -1e30)
        l_sc[...] = jnp.zeros_like(l_sc)
        z_sc[...] = jnp.zeros_like(z_sc)

    H = h_ref[0]                                   # (TILE_N, M), MXU input dtype
    w1 = w_ref[:, HP:]                             # (M, L)   lane-tile-aligned free view
    b1 = v_ref[1:2, :L]                            # (1, L)   f32
    w2 = v_ref[2:3, :L]                            # (1, L)   f32

    # Attention MLP for this tile: tanh(H @ w1 + b1); bf16 MXU inputs, f32 accumulation.
    hidden = jnp.tanh(
        jnp.dot(H, w1, preferred_element_type=jnp.float32) + b1)          # (TILE_N, L) f32

    # Second attention Linear(L, 1) as a lane-dense (1, TILE_N) row by contracting L.
    # Its bias b2 is a uniform shift that cancels in the softmax and is elided.
    scores = lax.dot_general(
        w2, hidden, (((1,), (1,)), ((), ())),
        preferred_element_type=jnp.float32)                               # (1, TILE_N)

    if n_valid < n_pad:                            # static: mask padded instances to -inf-ish
        idx = lax.broadcasted_iota(jnp.int32, (1, tile_n), 1) + k * tile_n
        scores = jnp.where(idx < n_valid, scores, jnp.float32(-1e30))

    scores_ref[0] = scores                         # unmasked lane-dense store

    # Online-softmax accumulator update (rescale whenever the running max moves).
    m_prev = m_sc[...]
    m_new = jnp.maximum(m_prev, jnp.max(scores, axis=-1, keepdims=True))  # (1, 1)
    alpha = jnp.exp(m_prev - m_new)
    p = jnp.exp(scores - m_new)                                           # (1, TILE_N) f32
    l_sc[...] = alpha * l_sc[...] + jnp.sum(p, axis=-1, keepdims=True)
    z_sc[...] = alpha * z_sc[...] + jnp.dot(
        p.astype(H.dtype), H, preferred_element_type=jnp.float32)         # (1, M) f32
    m_sc[...] = m_new

    @pl.when(k == pl.num_programs(1) - 1)
    def _finalize():
        w_heads = w_ref[:, :HP]                    # (M, HP) lane-tile-aligned free view
        b_heads = v_ref[0:1, :]                    # (1, HP) f32
        z = z_sc[...] / l_sc[...]                  # exact normalization (single scalar divide)
        out_ref[0] = jnp.dot(
            z.astype(w_heads.dtype), w_heads,
            preferred_element_type=jnp.float32) + b_heads


def init_abmil_params(key, M, L, num_cancers):
    """Deterministic parameter init (PyTorch-Linear shapes, stored transposed as (in, out))."""
    ks = jax.random.split(key, 10)
    scale = 0.05
    return dict(
        w1=scale * jax.random.normal(ks[0], (M, L), jnp.float32),
        b1=scale * jax.random.normal(ks[1], (1, L), jnp.float32),
        w2=scale * jax.random.normal(ks[2], (L, 1), jnp.float32),
        b2=scale * jax.random.normal(ks[3], (1, 1), jnp.float32),
        ws=scale * jax.random.normal(ks[4], (M, 1), jnp.float32),
        bs=scale * jax.random.normal(ks[5], (1, 1), jnp.float32),
        we=scale * jax.random.normal(ks[6], (M, 2), jnp.float32),
        be=scale * jax.random.normal(ks[7], (1, 2), jnp.float32),
        wc=scale * jax.random.normal(ks[8], (M, num_cancers), jnp.float32),
        bc=scale * jax.random.normal(ks[9], (1, num_cancers), jnp.float32),
    )


def pack_abmil_params(params, L, num_cancers, dtype=jnp.bfloat16):
    """Pack all weights/biases into two lane-dense slabs (3 input DMAs total incl. H).

    Weight slab is streamed in `dtype` (bf16 by default, feeding the MXU natively); the
    bias/vector slab stays f32 so bias adds and the w2 contraction happen in f32.
    """
    M = params["w1"].shape[0]
    HP = HEAD_PAD
    assert 3 + num_cancers <= HP, "fused head width exceeds one lane tile"

    w_slab = jnp.zeros((M, HP + L), jnp.float32)
    w_slab = w_slab.at[:, 0:1].set(params["ws"])
    w_slab = w_slab.at[:, 1:3].set(params["we"])
    w_slab = w_slab.at[:, 3:3 + num_cancers].set(params["wc"])
    w_slab = w_slab.at[:, HP:].set(params["w1"])

    v_slab = jnp.zeros((8, HP), jnp.float32)
    v_slab = v_slab.at[0, 0:1].set(params["bs"].reshape(-1))
    v_slab = v_slab.at[0, 1:3].set(params["be"].reshape(-1))
    v_slab = v_slab.at[0, 3:3 + num_cancers].set(params["bc"].reshape(-1))
    v_slab = v_slab.at[1, :L].set(params["b1"].reshape(-1))
    v_slab = v_slab.at[2, :L].set(params["w2"].reshape(-1))
    return w_slab.astype(dtype), v_slab


def _round_up(x, m):
    return (x + m - 1) // m * m


@functools.partial(jax.jit, static_argnames=("L", "num_cancers", "tile_n_max"))
def abmil_forward_batched(h_bags, w_slab, v_slab, *, L, num_cancers,
                          tile_n_max=DEFAULT_TILE_N):
    """h_bags: (B, N, M). Returns risk (B,1,1), event (B,1,2), cancer (B,1,C), att (B,1,N)."""
    B, N, M = h_bags.shape
    HP = HEAD_PAD

    # Lane-aligned tile of the instance axis; pad N up to a whole number of tiles.
    tile_n = min(int(tile_n_max), _round_up(N, 128))
    n_pad = _round_up(N, tile_n)
    num_tiles = n_pad // tile_n

    # Stream H in the slab dtype (bf16 by default).  In production H should already be
    # produced in bf16 upstream so this cast is free.
    h = h_bags.astype(w_slab.dtype)
    if n_pad != N:
        h = jnp.pad(h, ((0, 0), (0, n_pad - N), (0, 0)))

    kernel = functools.partial(
        _abmil_kernel, L=L, HP=HP, n_valid=N, n_pad=n_pad, tile_n=tile_n)

    out, scores = pl.pallas_call(
        kernel,
        out_shape=(
            jax.ShapeDtypeStruct((B, 1, HP), jnp.float32),     # fused head logits
            jax.ShapeDtypeStruct((B, 1, n_pad), jnp.float32),  # raw attention scores
        ),
        grid=(B, num_tiles),
        in_specs=[
            pl.BlockSpec((1, tile_n, M), lambda b, k: (b, k, 0)),
            pl.BlockSpec((M, HP + L), lambda b, k: (0, 0)),
            pl.BlockSpec((8, HP), lambda b, k: (0, 0)),
        ],
        out_specs=(
            pl.BlockSpec((1, 1, HP), lambda b, k: (b, 0, 0)),    # resident across k
            pl.BlockSpec((1, 1, tile_n), lambda b, k: (b, 0, k)),
        ),
        scratch_shapes=[
            pltpu.VMEM((1, 1), jnp.float32),   # running max
            pltpu.VMEM((1, 1), jnp.float32),   # running denominator
            pltpu.VMEM((1, M), jnp.float32),   # unnormalized pooled features
        ],
        compiler_params=pltpu.CompilerParams(
            dimension_semantics=("parallel", "arbitrary"),
            vmem_limit_bytes=VMEM_LIMIT_BYTES,
        ),
    )(h, w_slab, v_slab)

    risk = out[:, :, 0:1]
    event = out[:, :, 1:3]
    cancer = out[:, :, 3:3 + num_cancers]
    att = jax.nn.softmax(scores[:, :, :N], axis=-1)   # exact normalization in the wrapper
    return risk, event, cancer, att


def abmil_forward(x, params, return_att=False, dtype=jnp.bfloat16):
    """Single-bag forward matching the PyTorch module: x is (1, N, M)."""
    L = params["w1"].shape[1]
    num_cancers = params["wc"].shape[1]
    w_slab, v_slab = pack_abmil_params(params, L, num_cancers, dtype=dtype)
    risk, event, cancer, att = abmil_forward_batched(
        x, w_slab, v_slab, L=L, num_cancers=num_cancers)
    risk, event, cancer, att = risk[0], event[0], cancer[0], att[0]   # drop bag axis
    if return_att:
        return (risk, event, cancer), att
    return risk, event, cancer


def _abmil_reference(x, params):
    """Pure-JAX f32 reference for validation (mirrors the PyTorch forward)."""
    H = x[0]
    hidden = jnp.tanh(H @ params["w1"] + params["b1"])
    scores = hidden @ params["w2"] + params["b2"]        # (N, 1)
    A = jax.nn.softmax(scores.reshape(1, -1), axis=1)    # (1, N)
    Z = A @ H                                            # (1, M)
    risk = Z @ params["ws"] + params["bs"]
    event = Z @ params["we"] + params["be"]
    cancer = Z @ params["wc"] + params["bc"]
    return (risk, event, cancer), A


if __name__ == "__main__":
    # Small, forward-consistent shapes: bag of N=8 instances, D_feat=32, D_inner=16, 4 cancers.
    N, M, L, NUM_CANCERS = 8, 32, 16, 4
    TOL_BF16 = dict(atol=2e-2, rtol=2e-2)   # bf16 MXU inputs, f32 accumulation
    TOL_F32 = dict(atol=5e-3, rtol=5e-3)

    key = jax.random.PRNGKey(0)
    k_x, k_p, k_b, k_t = jax.random.split(key, 4)
    x = jax.random.normal(k_x, (1, N, M), jnp.float32)
    params = init_abmil_params(k_p, M, L, NUM_CANCERS)
    (r_ref, e_ref, c_ref), a_ref = _abmil_reference(x, params)

    # --- Single-bag forward, default bf16-streaming path (PyTorch-equivalent semantics). ---
    (risk, event, cancer), A = abmil_forward(x, params, return_att=True)
    jax.block_until_ready((risk, event, cancer, A))
    assert jnp.allclose(risk, r_ref, **TOL_BF16), "risk mismatch (bf16)"
    assert jnp.allclose(event, e_ref, **TOL_BF16), "event mismatch (bf16)"
    assert jnp.allclose(cancer, c_ref, **TOL_BF16), "cancer mismatch (bf16)"
    assert jnp.allclose(A, a_ref, **TOL_BF16), "attention mismatch (bf16)"
    assert jnp.allclose(jnp.sum(A, axis=-1), 1.0, atol=1e-5), "attention not normalized"

    # --- f32 streaming path (tighter check of the kernel math itself). ---
    w32, v32 = pack_abmil_params(params, L, NUM_CANCERS, dtype=jnp.float32)
    r32, e32, c32, a32 = abmil_forward_batched(x, w32, v32, L=L, num_cancers=NUM_CANCERS)
    jax.block_until_ready((r32, e32, c32, a32))
    assert jnp.allclose(r32[0], r_ref, **TOL_F32), "risk mismatch (f32)"
    assert jnp.allclose(e32[0], e_ref, **TOL_F32), "event mismatch (f32)"
    assert jnp.allclose(c32[0], c_ref, **TOL_F32), "cancer mismatch (f32)"
    assert jnp.allclose(a32[0], a_ref, **TOL_F32), "attention mismatch (f32)"

    # --- Batched path: many bags per pallas_call (bag axis parallel). ---
    B = 3
    xb = jax.random.normal(k_b, (B, N, M), jnp.float32)
    w_slab, v_slab = pack_abmil_params(params, L, NUM_CANCERS)
    rb, eb, cb, ab = abmil_forward_batched(xb, w_slab, v_slab, L=L, num_cancers=NUM_CANCERS)
    jax.block_until_ready((rb, eb, cb, ab))
    for b in range(B):
        (rr, ee, cc), aa = _abmil_reference(xb[b:b + 1], params)
        assert jnp.allclose(rb[b], rr, **TOL_BF16), f"batched risk mismatch bag {b}"
        assert jnp.allclose(eb[b], ee, **TOL_BF16), f"batched event mismatch bag {b}"
        assert jnp.allclose(cb[b], cc, **TOL_BF16), f"batched cancer mismatch bag {b}"
        assert jnp.allclose(ab[b], aa, **TOL_BF16), f"batched attention mismatch bag {b}"

    # --- Multi-tile online-softmax path with N padding + masking (N=200, TILE_N=128, 2 tiles). ---
    B2, N2 = 2, 200
    xt = jax.random.normal(k_t, (B2, N2, M), jnp.float32)
    rt, et, ct, at = abmil_forward_batched(
        xt, w_slab, v_slab, L=L, num_cancers=NUM_CANCERS, tile_n_max=128)
    jax.block_until_ready((rt, et, ct, at))
    for b in range(B2):
        (rr, ee, cc), aa = _abmil_reference(xt[b:b + 1], params)
        assert jnp.allclose(rt[b], rr, **TOL_BF16), f"tiled risk mismatch bag {b}"
        assert jnp.allclose(et[b], ee, **TOL_BF16), f"tiled event mismatch bag {b}"
        assert jnp.allclose(ct[b], cc, **TOL_BF16), f"tiled cancer mismatch bag {b}"
        assert jnp.allclose(at[b], aa, **TOL_BF16), f"tiled attention mismatch bag {b}"
        assert jnp.allclose(jnp.sum(at[b], axis=-1), 1.0, atol=1e-5), "tiled att not normalized"

    print("KERNEL_OK")
</pallas_src>

<mosaic_0001>
module attributes {stable_mosaic.version = 11 : i64} {
  func.func @_abmil_kernel(%arg0: i32, %arg1: i32, %arg2: memref<1x128x32xbf16, #tpu.memory_space<vmem>>, %arg3: memref<32x144xbf16, #tpu.memory_space<vmem>>, %arg4: memref<8x128xf32, #tpu.memory_space<vmem>>, %arg5: memref<1x1x128xf32, #tpu.memory_space<vmem>>, %arg6: memref<1x1x128xf32, #tpu.memory_space<vmem>>, %arg7: memref<1x1xf32, #tpu.memory_space<vmem>>, %arg8: memref<1x1xf32, #tpu.memory_space<vmem>>, %arg9: memref<1x32xf32, #tpu.memory_space<vmem>>) attributes {dimension_semantics = [#tpu.dimension_semantics<parallel>, #tpu.dimension_semantics<arbitrary>], iteration_bounds = array<i64: 1, 1>, scalar_prefetch = 0 : i64, scratch_operands = 3 : i64, tpu.core_type = #tpu.core_type<tc>, window_params = [{transform_indices = @transform_0, window_bounds = array<i64: 1, 128, 32>}, {pipeline_mode = #tpu.pipeline_mode<synchronous>, transform_indices = @transform_1, window_bounds = array<i64: 32, 144>}, {pipeline_mode = #tpu.pipeline_mode<synchronous>, transform_indices = @transform_2, window_bounds = array<i64: 8, 128>}, {transform_indices = @transform_3, window_bounds = array<i64: 1, 1, 128>}, {transform_indices = @transform_4, window_bounds = array<i64: 1, 1, 128>}]} {
    %c0_i32 = arith.constant 0 : i32
    %0 = arith.cmpi eq, %arg1, %c0_i32 : i32
    %1 = arith.extui %0 : i1 to i32
    %c0_i32_0 = arith.constant 0 : i32
    %2 = arith.cmpi ne, %1, %c0_i32_0 : i32
    scf.if %2 {
      %cst_28 = arith.constant -1.000000e+30 : f32
      %50 = vector.broadcast %cst_28 : f32 to vector<1x1xf32>
      %c0_29 = arith.constant 0 : index
      %c0_30 = arith.constant 0 : index
      %51 = vector.load %arg7[%c0_29, %c0_30] : memref<1x1xf32, #tpu.memory_space<vmem>>, vector<1x1xf32>
      tpu.vector_store %arg7[%c0_29, %c0_30], %50 {strides = array<i32>} : memref<1x1xf32, #tpu.memory_space<vmem>>, vector<1x1xf32>,
      %cst_31 = arith.constant 0.000000e+00 : f32
      %52 = vector.broadcast %cst_31 : f32 to vector<1x1xf32>
      %c0_32 = arith.constant 0 : index
      %c0_33 = arith.constant 0 : index
      %53 = vector.load %arg8[%c0_32, %c0_33] : memref<1x1xf32, #tpu.memory_space<vmem>>, vector<1x1xf32>
      tpu.vector_store %arg8[%c0_32, %c0_33], %52 {strides = array<i32>} : memref<1x1xf32, #tpu.memory_space<vmem>>, vector<1x1xf32>,
      %cst_34 = arith.constant 0.000000e+00 : f32
      %54 = vector.broadcast %cst_34 : f32 to vector<1x32xf32>
      %c0_35 = arith.constant 0 : index
      %c0_36 = arith.constant 0 : index
      %55 = vector.load %arg9[%c0_35, %c0_36] : memref<1x32xf32, #tpu.memory_space<vmem>>, vector<1x32xf32>
      tpu.vector_store %arg9[%c0_35, %c0_36], %54 {strides = array<i32>} : memref<1x32xf32, #tpu.memory_space<vmem>>, vector<1x32xf32>,
    } else {
    }
    %c0 = arith.constant 0 : index
    %c0_1 = arith.constant 0 : index
    %c0_2 = arith.constant 0 : index
    %3 = vector.load %arg2[%c0, %c0_1, %c0_2] : memref<1x128x32xbf16, #tpu.memory_space<vmem>>, vector<1x128x32xbf16>
    %4 = vector.shape_cast %3 : vector<1x128x32xbf16> to vector<128x32xbf16>
    %c0_3 = arith.constant 0 : index
    %c128 = arith.constant 128 : index
    %5 = vector.load %arg3[%c0_3, %c128] : memref<32x144xbf16, #tpu.memory_space<vmem>>, vector<32x16xbf16>
    %c1 = arith.constant 1 : index
    %c0_4 = arith.constant 0 : index
    %6 = vector.load %arg4[%c1, %c0_4] : memref<8x128xf32, #tpu.memory_space<vmem>>, vector<1x16xf32>
    %c2 = arith.constant 2 : index
    %c0_5 = arith.constant 0 : index
    %7 = vector.load %arg4[%c2, %c0_5] : memref<8x128xf32, #tpu.memory_space<vmem>>, vector<1x16xf32>
    %cst = arith.constant dense<0.000000e+00> : vector<128x16xf32>
    %8 = tpu.matmul %4, %5, %cst {dimension_numbers = #tpu.dot_dimension_numbers<[1], [0], [0], [1], [0, 0, 1, 1], [], []>} : vector<128x32xbf16>, vector<32x16xbf16>, vector<128x16xf32> -> vector<128x16xf32>
    %9 = vector.broadcast %6 : vector<1x16xf32> to vector<128x16xf32>
    %10 = arith.addf %8, %9 : vector<128x16xf32>
    %11 = math.tanh %10 : vector<128x16xf32>
    %cst_6 = arith.constant dense<0.000000e+00> : vector<1x128xf32>
    %12 = tpu.matmul %7, %11, %cst_6 {dimension_numbers = #tpu.dot_dimension_numbers<[1], [1], [0], [0], [0, 0, 1, 0], [], []>} : vector<1x16xf32>, vector<128x16xf32>, vector<1x128xf32> -> vector<1x128xf32>
    %13 = tpu.iota {dimensions = array<i32: 1>} : vector<1x128xi32>
    %c128_i32 = arith.constant 128 : i32
    %14 = arith.muli %arg1, %c128_i32 : i32
    %15 = vector.broadcast %14 : i32 to vector<1x128xi32>
    %16 = arith.addi %13, %15 : vector<1x128xi32>
    %c8_i32 = arith.constant 8 : i32
    %17 = vector.broadcast %c8_i32 : i32 to vector<1x128xi32>
    %18 = arith.cmpi slt, %16, %17 : vector<1x128xi32>
    %cst_7 = arith.constant -1.000000e+30 : f32
    %19 = vector.broadcast %cst_7 : f32 to vector<1x128xf32>
    %20 = arith.select %18, %12, %19 : vector<1x128xi1>, vector<1x128xf32>
    %c0_8 = arith.constant 0 : index
    %c0_9 = arith.constant 0 : index
    %c0_10 = arith.constant 0 : index
    %21 = vector.load %arg6[%c0_8, %c0_9, %c0_10] : memref<1x1x128xf32, #tpu.memory_space<vmem>>, vector<1x1x128xf32>
    %22 = vector.shape_cast %21 : vector<1x1x128xf32> to vector<1x128xf32>
    %23 = vector.shape_cast %20 : vector<1x128xf32> to vector<1x1x128xf32>
    tpu.vector_store %arg6[%c0_8, %c0_9, %c0_10], %23 {strides = array<i32>} : memref<1x1x128xf32, #tpu.memory_space<vmem>>, vector<1x1x128xf32>,
    %c0_11 = arith.constant 0 : index
    %c0_12 = arith.constant 0 : index
    %24 = vector.load %arg7[%c0_11, %c0_12] : memref<1x1xf32, #tpu.memory_space<vmem>>, vector<1x1xf32>
    %cst_13 = arith.constant dense<0xFF800000> : vector<1xf32>
    %25 = vector.multi_reduction <maximumf>, %20, %cst_13 [1] : vector<1x128xf32> to vector<1xf32>
    %26 = vector.shape_cast %25 : vector<1xf32> to vector<1x1xf32>
    %27 = arith.maximumf %24, %26 : vector<1x1xf32>
    %28 = arith.subf %24, %27 : vector<1x1xf32>
    %29 = math.exp %28 : vector<1x1xf32>
    %30 = vector.broadcast %27 : vector<1x1xf32> to vector<1x128xf32>
    %31 = arith.subf %20, %30 : vector<1x128xf32>
    %32 = math.exp %31 : vector<1x128xf32>
    %c0_14 = arith.constant 0 : index
    %c0_15 = arith.constant 0 : index
    %33 = vector.load %arg8[%c0_14, %c0_15] : memref<1x1xf32, #tpu.memory_space<vmem>>, vector<1x1xf32>
    %34 = arith.mulf %29, %33 : vector<1x1xf32>
    %cst_16 = arith.constant dense<0.000000e+00> : vector<1xf32>
    %35 = vector.multi_reduction <add>, %32, %cst_16 [1] : vector<1x128xf32> to vector<1xf32>
    %36 = vector.shape_cast %35 : vector<1xf32> to vector<1x1xf32>
    %37 = arith.addf %34, %36 : vector<1x1xf32>
    %c0_17 = arith.constant 0 : index
    %c0_18 = arith.constant 0 : index
    %38 = vector.load %arg8[%c0_17, %c0_18] : memref<1x1xf32, #tpu.memory_space<vmem>>, vector<1x1xf32>
    tpu.vector_store %arg8[%c0_17, %c0_18], %37 {strides = array<i32>} : memref<1x1xf32, #tpu.memory_space<vmem>>, vector<1x1xf32>,
    %c0_19 = arith.constant 0 : index
    %c0_20 = arith.constant 0 : index
    %39 = vector.load %arg9[%c0_19, %c0_20] : memref<1x32xf32, #tpu.memory_space<vmem>>, vector<1x32xf32>
    %40 = vector.broadcast %29 : vector<1x1xf32> to vector<1x32xf32>
    %41 = arith.mulf %40, %39 : vector<1x32xf32>
    %42 = arith.truncf %32 : vector<1x128xf32> to vector<1x128xbf16>
    %cst_21 = arith.constant dense<0.000000e+00> : vector<1x32xf32>
    %43 = tpu.matmul %42, %4, %cst_21 {dimension_numbers = #tpu.dot_dimension_numbers<[1], [0], [0], [1], [0, 0, 1, 1], [], []>} : vector<1x128xbf16>, vector<128x32xbf16>, vector<1x32xf32> -> vector<1x32xf32>
    %44 = arith.addf %41, %43 : vector<1x32xf32>
    %c0_22 = arith.constant 0 : index
    %c0_23 = arith.constant 0 : index
    %45 = vector.load %arg9[%c0_22, %c0_23] : memref<1x32xf32, #tpu.memory_space<vmem>>, vector<1x32xf32>
    tpu.vector_store %arg9[%c0_22, %c0_23], %44 {strides = array<i32>} : memref<1x32xf32, #tpu.memory_space<vmem>>, vector<1x32xf32>,
    %c0_24 = arith.constant 0 : index
    %c0_25 = arith.constant 0 : index
    %46 = vector.load %arg7[%c0_24, %c0_25] : memref<1x1xf32, #tpu.memory_space<vmem>>, vector<1x1xf32>
    tpu.vector_store %arg7[%c0_24, %c0_25], %27 {strides = array<i32>} : memref<1x1xf32, #tpu.memory_space<vmem>>, vector<1x1xf32>,
    %c0_i32_26 = arith.constant 0 : i32
    %47 = arith.cmpi eq, %arg1, %c0_i32_26 : i32
    %48 = arith.extui %47 : i1 to i32
    %c0_i32_27 = arith.constant 0 : i32
    %49 = arith.cmpi ne, %48, %c0_i32_27 : i32
    scf.if %49 {
      %c0_28 = arith.constant 0 : index
      %c0_29 = arith.constant 0 : index
      %50 = vector.load %arg3[%c0_28, %c0_29] : memref<32x144xbf16, #tpu.memory_space<vmem>>, vector<32x128xbf16>
      %c0_30 = arith.constant 0 : index
      %c0_31 = arith.constant 0 : index
      %51 = vector.load %arg4[%c0_30, %c0_31] : memref<8x128xf32, #tpu.memory_space<vmem>>, vector<1x128xf32>
      %c0_32 = arith.constant 0 : index
      %c0_33 = arith.constant 0 : index
      %52 = vector.load %arg9[%c0_32, %c0_33] : memref<1x32xf32, #tpu.memory_space<vmem>>, vector<1x32xf32>
      %c0_34 = arith.constant 0 : index
      %c0_35 = arith.constant 0 : index
      %53 = vector.load %arg8[%c0_34, %c0_35] : memref<1x1xf32, #tpu.memory_space<vmem>>, vector<1x1xf32>
      %54 = vector.broadcast %53 : vector<1x1xf32> to vector<1x32xf32>
      %55 = arith.divf %52, %54 : vector<1x32xf32>
      %56 = arith.truncf %55 : vector<1x32xf32> to vector<1x32xbf16>
      %cst_36 = arith.constant dense<0.000000e+00> : vector<1x128xf32>
      %57 = tpu.matmul %56, %50, %cst_36 {dimension_numbers = #tpu.dot_dimension_numbers<[1], [0], [0], [1], [0, 0, 1, 1], [], []>} : vector<1x32xbf16>, vector<32x128xbf16>, vector<1x128xf32> -> vector<1x128xf32>
      %58 = arith.addf %57, %51 : vector<1x128xf32>
      %c0_37 = arith.constant 0 : index
      %c0_38 = arith.constant 0 : index
      %c0_39 = arith.constant 0 : index
      %59 = vector.load %arg5[%c0_37, %c0_38, %c0_39] : memref<1x1x128xf32, #tpu.memory_space<vmem>>, vector<1x1x128xf32>
      %60 = vector.shape_cast %59 : vector<1x1x128xf32> to vector<1x128xf32>
      %61 = vector.shape_cast %58 : vector<1x128xf32> to vector<1x1x128xf32>
      tpu.vector_store %arg5[%c0_37, %c0_38, %c0_39], %61 {strides = array<i32>} : memref<1x1x128xf32, #tpu.memory_space<vmem>>, vector<1x1x128xf32>,
    } else {
    }
    return
  }
  func.func @transform_0(%arg0: i32, %arg1: i32) -> (i32, i32, i32) {
    %c0_i32 = arith.constant 0 : i32
    %c0_i32_0 = arith.constant 0 : i32
    return %arg0, %arg1, %c0_i32 : i32, i32, i32
  }
  func.func @transform_1(%arg0: i32, %arg1: i32) -> (i32, i32) {
    %c0_i32 = arith.constant 0 : i32
    %c0_i32_0 = arith.constant 0 : i32
    %c0_i32_1 = arith.constant 0 : i32
    return %c0_i32, %c0_i32_0 : i32, i32
  }
  func.func @transform_2(%arg0: i32, %arg1: i32) -> (i32, i32) {
    %c0_i32 = arith.constant 0 : i32
    %c0_i32_0 = arith.constant 0 : i32
    %c0_i32_1 = arith.constant 0 : i32
    return %c0_i32, %c0_i32_0 : i32, i32
  }
  func.func @transform_3(%arg0: i32, %arg1: i32) -> (i32, i32, i32) {
    %c0_i32 = arith.constant 0 : i32
    %c0_i32_0 = arith.constant 0 : i32
    %c0_i32_1 = arith.constant 0 : i32
    return %arg0, %c0_i32, %c0_i32_0 : i32, i32, i32
  }
  func.func @transform_4(%arg0: i32, %arg1: i32) -> (i32, i32, i32) {
    %c0_i32 = arith.constant 0 : i32
    %c0_i32_0 = arith.constant 0 : i32
    return %arg0, %c0_i32, %arg1 : i32, i32, i32
  }
}

</mosaic_0001>

<bundles_post_ra>
// kernel: abmil_forward_batched.1
= control target key start
LH: loop header
LB: loop body
LE: loop exit
PB: predicated region body
PF: predicated region fallthrough
CT: control target
= control target key end

     0   :  { %vm104_vm0 = vcmask 261120   ;;  %v768_v10 = vmov 0.0   ;;  %vm769_vm1 = vmmov 0   ;;  %vm242_vm2 = vcmask 130048   ;;  %s946_s1 = inlined_call_operand.vmem [shape: bf16[32,144], index: 1, kind: input, shape index: {}]   ;;  %s947_s0 = inlined_call_operand.vmem [shape: bf16[1,128,32], index: 0, kind: input, shape index: {}]   ;;  %s948_s2 = inlined_call_operand.vmem [shape: f32[8,128], index: 2, kind: input, shape index: {}]   ;;  %s949_s4 = inlined_call_operand.vmem [shape: f32[1,1,128], index: 4, kind: output, shape index: {1}]   ;;  %s950_s3 = inlined_call_operand.vmem [shape: f32[1,1,128], index: 3, kind: output, shape index: {0}]  }
   0x1   :  { %v718_v0 = vld [vmem:[%s946_s1 + $0x14] ss:$8 sps:$4 sm:$0xff]   ;;  %v719_v1 = vld [vmem:[%s946_s1 + $0x4] ss:$8 sps:$4 sm:$0xff]   ;;  %649 = vmatprep.subr.mxu1 %v768_v10  ;;  %681 = vmatprep.mubr.msk.f32.mxu1 %vm769_vm1, %v768_v10  ;;  %v860_v25 = vld [vmem:[%s948_s2 + $0x1] ss:$0 sm:$0xff]  ;;  %v364_v62 = vlaneseq }
   0x2   :  { %629 = vmatprep.subr.bf16.mxu0 %v718_v0  ;;  %v720_v2 = vld [vmem:[%s947_s0] sm:$0xff]   ;;  %v721_v3 = vld [vmem:[%s947_s0 + $0x8] sm:$0xff]   ;;  %v722_v4 = vld [vmem:[%s947_s0 + $0x10] sm:$0xff]   ;;  %vm21_vm3 = vcmask 0   ;;  %v770_v61 = vmov -1e+30  }
   0x3   :  { %630 = vmatpush3.bf16.msra.mxu0 %v718_v0  ;;  %633 = vmatprep.mubr.msk.bf16.mxu0 %vm104_vm0, %v720_v2  ;;  %v723_v5 = vld [vmem:[%s947_s0 + $0x18] sm:$0xff]   ;;  %v724_v6 = vld [vmem:[%s947_s0 + $0x20] sm:$0xff]   ;;  %v725_v7 = vld [vmem:[%s947_s0 + $0x28] sm:$0xff]   ;;  %22 = vst.msk [vmem:[#allocation2] sm:$0x1] %vm21_vm3, %v770_v61  ;;  %v365_v63 = vand.u32 127, %v364_v62 }
   0x4   :  { %631 = vmatprep.subr.bf16.mxu0 %v719_v1  ;;  %v726_v8 = vld [vmem:[%s947_s0 + $0x30] sm:$0xff]   ;;  %v727_v9 = vld [vmem:[%s947_s0 + $0x38] sm:$0xff]   ;;  %v47_v60 = vld [vmem:[%s948_s2 + $0x2] sm:$0x1]  ;;  %23 = vst.msk [vmem:[#allocation3] sm:$0x1] %vm21_vm3, %v768_v10 }
   0x5   :  { %vm369_vm4 = vcmp.lt.s32.totalorder %v365_v63, 8  ;;  %vm373_vm5 = vcmask 1040384   ;;  %vm24_vm6 = vcmask 253952  }
   0x6   :  { %25 = vst.msk [vmem:[#allocation4] sm:$0x1] %vm24_vm6, %v768_v10 }
   0x7   :  { %632 = vmatpush3.bf16.msra.mxu0 %v719_v1 }
   0x8   :  { %684 = vmatprep.subr.bf16.mxu0 %v768_v10 }
   0xa   :  { %634 = vmatmul.mubr.msk.bf16.vlgmr.msra.gmra.mxu0 %vm104_vm0, %v721_v3 }
   0xb   :  { %637 = vmatprep.mubr.msk.bf16.mxu0 %vm104_vm0, %v722_v4  ;;  %685 = vmatpush3.bf16.msra.mxu0 %v727_v9 }
   0xc   :  { %686 = vmatprep.subr.bf16.mxu0 %v768_v10 }
   0xf   :  { %687 = vmatpush3.bf16.msra.mxu0 %v726_v8 }
  0x10   :  { %688 = vmatprep.subr.bf16.mxu0 %v768_v10 }
  0x12   :  { %638 = vmatmul.mubr.msk.bf16.gmra.mxu0 %vm104_vm0, %v723_v5 }
  0x13   :  { %641 = vmatprep.mubr.msk.bf16.mxu0 %vm104_vm0, %v724_v6  ;;  %689 = vmatpush3.bf16.msra.mxu0 %v725_v7 }
  0x14   :  { %690 = vmatprep.subr.bf16.mxu0 %v768_v10 }
  0x17   :  { %691 = vmatpush3.bf16.msra.mxu0 %v724_v6 }
  0x18   :  { %692 = vmatprep.subr.bf16.mxu0 %v768_v10 }
  0x1a   :  { %642 = vmatmul.mubr.msk.bf16.gmra.mxu0 %vm104_vm0, %v725_v7 }
  0x1b   :  { %645 = vmatprep.mubr.msk.bf16.mxu0 %vm104_vm0, %v726_v8  ;;  %693 = vmatpush3.bf16.msra.mxu0 %v723_v5  ;;  %v372_v5 = vld [vmem:[#allocation2] sm:$0x1] }
  0x1c   :  { %694 = vmatprep.subr.bf16.mxu0 %v768_v10 }
  0x1f   :  { %695 = vmatpush3.bf16.msra.mxu0 %v722_v4  ;;  %v771_v4 = vmov 0  }
  0x20   :  { %696 = vmatprep.subr.bf16.mxu0 %v768_v10  ;;  %716 = vset.pattern.permute.xlu0 %v771_v4 }
  0x21   :  { %717 = vset.pattern.permute.xlu1 %v771_v4 }
  0x22   :  { %646 = vmatmul.mubr.msk.bf16.gmra.mxu0 %vm104_vm0, %v727_v9  ;;  %v387_v9 = vshrl.u32 %v364_v62, 7 }
  0x23   :  { %697 = vmatpush3.bf16.msra.mxu0 %v721_v3  ;;  %700 = vmatprep.mubr.msk.bf16.mxu0 %vm769_vm1, %v768_v10 }
  0x24   :  { %698 = vmatprep.subr.bf16.mxu0 %v768_v10 }
  0x27   :  { %699 = vmatpush3.bf16.msra.mxu0 %v720_v2 }
  0x28   :  { %704 = vmatprep.subr.bf16.mxu0 %v768_v10 }
  0xca   :  { %v849_v11 = vpop.f32.mrf.mxu0 }
  0xcb   :  { %v172_v50 = vadd.f32 %v849_v11, %v860_v25  ;;  %v388_v11 = vsub.s32 0, %v387_v9 }
  0xcc   :  { %v851_v12 = vpop.f32.mrf.mxu0 }
  0xcd   :  { %v164_v54 = vadd.f32 %v860_v25, %v851_v12 }
  0xce   :  { %v853_v13 = vpop.f32.mrf.mxu0 }
  0xcf   :  { %v175_v48 = vadd.f32 %v853_v13, %v860_v25 }
  0xd0   :  { %v855_v14 = vpop.f32.mrf.mxu0 }
  0xd1   :  { %v167_v52 = vadd.f32 %v860_v25, %v855_v14 }
  0xd2   :  { %v639_v15 = vpop.f32.mrf.mxu0 }
  0xd3   :  { %v188_v42 = vadd.f32 %v639_v15, %v860_v25 }
  0xd4   :  { %v179_v16 = vpop.f32.mrf.mxu0 }
  0xd5   :  { %v180_v46 = vadd.f32 %v860_v25, %v179_v16 }
  0xd6   :  { %v640_v17 = vpop.f32.mrf.mxu0 }
  0xd7   :  { %v191_v40 = vadd.f32 %v640_v17, %v860_v25 }
  0xd8   :  { %v182_v18 = vpop.f32.mrf.mxu0 }
  0xd9   :  { %v183_v44 = vadd.f32 %v860_v25, %v182_v18 }
  0xda   :  { %v643_v19 = vpop.f32.mrf.mxu0 }
  0xdb   :  { %v204_v34 = vadd.f32 %v643_v19, %v860_v25 }
  0xdc   :  { %v195_v20 = vpop.f32.mrf.mxu0 }
  0xdd   :  { %v196_v38 = vadd.f32 %v860_v25, %v195_v20 }
  0xde   :  { %v644_v21 = vpop.f32.mrf.mxu0 }
  0xdf   :  { %v207_v32 = vadd.f32 %v644_v21, %v860_v25  ;;  %v393_v21 = vld [vmem:[#allocation3] sm:$0x1] }
  0xe0   :  { %v198_v22 = vpop.f32.mrf.mxu0 }
  0xe1   :  { %v199_v36 = vadd.f32 %v860_v25, %v198_v22 }
  0xe2   :  { %v647_v23 = vpop.f32.mrf.mxu0 }
  0xe3   :  { %v220_v28 = vadd.f32 %v647_v23, %v860_v25 }
  0xe4   :  { %v211_v24 = vpop.f32.mrf.mxu0 }
  0xe5   :  { %v212_v31 = vadd.f32 %v860_v25, %v211_v24 }
  0xe6   :  { %v648_v26 = vpop.f32.mrf.mxu0 }
  0xe7   :  { %v223_v27 = vadd.f32 %v648_v26, %v860_v25  ;;  %v728_v26 = vld [vmem:[%s946_s1 + $0x10] ss:$8 sps:$4 sm:$0xff]  }
  0xe8   :  { %v214_v29 = vpop.f32.mrf.mxu0 }
  0xe9   :  { %730 = vtanh.f32 %v223_v27  ;;  %v215_v30 = vadd.f32 %v860_v25, %v214_v29  ;;  %v729_v27 = vld [vmem:[%s946_s1] ss:$8 sps:$4 sm:$0xff]  }
  0xea   :  { %732 = vtanh.f32 %v220_v28 }
  0xeb   :  { %734 = vtanh.f32 %v215_v30 }
  0xec   :  { %736 = vtanh.f32 %v212_v31 }
  0xed   :  { %738 = vtanh.f32 %v207_v32 }
  0xee   :  { %740 = vtanh.f32 %v204_v34  ;;  %v401_v34 = vld [vmem:[#allocation4] sm:$0x1] }
  0xef   :  { %742 = vtanh.f32 %v199_v36 }
  0xf0   :  { %744 = vtanh.f32 %v196_v38 }
  0xf1   :  { %746 = vtanh.f32 %v191_v40 }
  0xf2   :  { %748 = vtanh.f32 %v188_v42 }
  0xf3   :  { %750 = vtanh.f32 %v183_v44 }
  0xf4   :  { %752 = vtanh.f32 %v180_v46 }
  0xf5   :  { %754 = vtanh.f32 %v175_v48 }
  0xf6   :  { %v731_v33 = vpop.eup %730  ;;  %756 = vtanh.f32 %v172_v50 }
  0xf7   :  { %650 = vmatpush3.xpose.msk.msra.mxu1 %vm242_vm2, %v731_v33  ;;  %v733_v35 = vpop.eup %732  ;;  %758 = vtanh.f32 %v167_v52 }
  0xf8   :  { %651 = vmatprep.subr.mxu1 %v768_v10  ;;  %v735_v37 = vpop.eup %734  ;;  %760 = vtanh.f32 %v164_v54 }
  0xf9   :  { %v737_v39 = vpop.eup %736 }
  0xfa   :  { %v739_v41 = vpop.eup %738 }
  0xfb   :  { %652 = vmatpush3.xpose.msk.msra.mxu1 %vm242_vm2, %v733_v35  ;;  %v741_v43 = vpop.eup %740 }
  0xfc   :  { %653 = vmatprep.subr.mxu1 %v768_v10  ;;  %v743_v45 = vpop.eup %742 }
  0xfd   :  { %v745_v47 = vpop.eup %744 }
  0xfe   :  { %v747_v49 = vpop.eup %746 }
  0xff   :  { %654 = vmatpush3.xpose.msk.msra.mxu1 %vm242_vm2, %v735_v37  ;;  %v749_v51 = vpop.eup %748 }
 0x100   :  { %655 = vmatprep.subr.mxu1 %v768_v10  ;;  %v751_v53 = vpop.eup %750 }
 0x101   :  { %v753_v55 = vpop.eup %752 }
 0x102   :  { %v755_v56 = vpop.eup %754 }
 0x103   :  { %656 = vmatpush3.xpose.msk.msra.mxu1 %vm242_vm2, %v737_v39  ;;  %v757_v57 = vpop.eup %756 }
 0x104   :  { %657 = vmatprep.subr.mxu1 %v768_v10  ;;  %v759_v58 = vpop.eup %758 }
 0x105   :  { %v761_v59 = vpop.eup %760 }
 0x107   :  { %658 = vmatpush3.xpose.msk.msra.mxu1 %vm242_vm2, %v739_v41 }
 0x108   :  { %659 = vmatprep.subr.mxu1 %v768_v10 }
 0x10b   :  { %660 = vmatpush3.xpose.msk.msra.mxu1 %vm242_vm2, %v741_v43 }
 0x10c   :  { %661 = vmatprep.subr.mxu1 %v768_v10 }
 0x10f   :  { %662 = vmatpush3.xpose.msk.msra.mxu1 %vm242_vm2, %v743_v45 }
 0x110   :  { %663 = vmatprep.subr.mxu1 %v768_v10 }
 0x113   :  { %664 = vmatpush3.xpose.msk.msra.mxu1 %vm242_vm2, %v745_v47 }
 0x114   :  { %665 = vmatprep.subr.mxu1 %v768_v10 }
 0x117   :  { %666 = vmatpush3.xpose.msk.msra.mxu1 %vm242_vm2, %v747_v49 }
 0x118   :  { %667 = vmatprep.subr.mxu1 %v768_v10 }
 0x11b   :  { %668 = vmatpush3.xpose.msk.msra.mxu1 %vm242_vm2, %v749_v51 }
 0x11c   :  { %669 = vmatprep.subr.mxu1 %v768_v10 }
 0x11f   :  { %670 = vmatpush3.xpose.msk.msra.mxu1 %vm242_vm2, %v751_v53 }
 0x120   :  { %671 = vmatprep.subr.mxu1 %v768_v10 }
 0x123   :  { %672 = vmatpush3.xpose.msk.msra.mxu1 %vm242_vm2, %v753_v55 }
 0x124   :  { %673 = vmatprep.subr.mxu1 %v768_v10 }
 0x127   :  { %674 = vmatpush3.xpose.msk.msra.mxu1 %vm242_vm2, %v755_v56 }
 0x128   :  { %675 = vmatprep.subr.mxu1 %v768_v10 }
 0x12b   :  { %676 = vmatpush3.xpose.msk.msra.mxu1 %vm242_vm2, %v757_v57 }
 0x12c   :  { %677 = vmatprep.subr.mxu1 %v768_v10 }
 0x12f   :  { %678 = vmatpush3.xpose.msk.msra.mxu1 %vm242_vm2, %v759_v58 }
 0x130   :  { %679 = vmatprep.subr.mxu1 %v768_v10 }
 0x133   :  { %680 = vmatpush3.xpose.msk.msra.mxu1 %vm242_vm2, %v761_v59 }
 0x136   :  { %682 = vmatmul.mubr.msk.f32.vlgmr.msra.gmra.mxu1 %vm242_vm2, %v47_v60 }
 0x1f6   :  { %v360_v0 = vpop.f32.mrf.mxu1 }
 0x1f7   :  { %v370_v1 = vsel %vm369_vm4, %v360_v0, -1e+30 }
 0x1f8   :  { %371 = vst [vmem:[%s949_s4] sm:$0x1] %v370_v1  ;;  %v683_v2 = vpop.f32.mrf.mxu1  ;;  %v374_v3 = vsel %vm373_vm5, %v370_v1, -inf }
 0x1f9   :  { %375 = vmax.xlane.f32.xlu0 %v374_v3 }
 0x282   :  { %v376_v6 = vpop.xlane.xlu0 %375 }
 0x283   :  { %v377_v7 = vmax.f32 %v372_v5, %v376_v6 }
 0x285   :  { %v378_v8 = vsub.f32 %v372_v5, %v377_v7  ;;  %464 = vst.msk [vmem:[#allocation2] sm:$0x1] %vm21_vm3, %v377_v7  ;;  %383 = vperm.xlu0 %716, %v377_v7  }
 0x287   :  { %v379_v19 = vmul.f32 1.442695, %v378_v8 }
 0x300   :  { %v384_v12 = vpop.permute.xlu0 %383 }
 0x301   :  { %v389_v13 = vrot.slane %v384_v12, %v388_v11 }
 0x303   :  { %v390_v14 = vsub.f32 %v370_v1, %v389_v13 }
 0x305   :  { %v391_v15 = vmul.f32 1.442695, %v390_v14 }
 0x307   :  { %762 = vpow2.f32 %v391_v15 }
 0x308   :  { %764 = vpow2.f32 %v379_v19 }
 0x314   :  { %v763_v16 = vpop.eup %762 }
 0x315   :  { %v395_v17 = vsel %vm373_vm5, %v763_v16, 0.0  ;;  %v412_v18 = vpack.c.bf16 %v763_v16, %v763_v16  ;;  %v765_v20 = vpop.eup %764 }
 0x316   :  { %396 = vadd.xlane.f32.xlu1 %v395_v17  ;;  %v394_v22 = vmul.f32 %v765_v20, %v393_v21 }
 0x317   :  { %701 = vmatmul.mubr.bf16.vlgmr.msra.gmra.mxu0 %v412_v18 }
 0x318   :  { %708 = vmatprep.mubr.msk.bf16.mxu0 %vm769_vm1, %v768_v10  ;;  %705 = vmatpush3.bf16.msra.mxu0 %v728_v26 }
 0x319   :  { %706 = vmatprep.subr.bf16.mxu0 %v768_v10  ;;  %v472_v10 = vld [vmem:[%s948_s2] sm:$0x1] }
 0x31c   :  { %707 = vmatpush3.bf16.msra.mxu0 %v729_v27 }
 0x39f   :  { %v397_v23 = vpop.xlane.xlu1 %396 }
 0x3a0   :  { %v398_v24 = vadd.f32 %v397_v23, %v394_v22 }
 0x3a2   :  { %400 = vst.msk [vmem:[#allocation3] sm:$0x1] %vm21_vm3, %v398_v24 }
 0x3a9   :  { %v474_v25 = vld [vmem:[#allocation3] sm:$0x1] }
 0x3aa   :  { %477 = vperm.xlu1 %717, %v474_v25  }
 0x3ae   :  { %404 = vperm.xlu1 %717, %v765_v20  }
 0x3d7   :  { %v455_v28 = vpop.f32.mrf.mxu0 }
 0x3d9   :  { %v702_v29 = vpop.f32.mrf.mxu0 }
 0x3db   :  { %v458_v30 = vpop.f32.mrf.mxu0 }
 0x3dd   :  { %v703_v31 = vpop.f32.mrf.mxu0 }
 0x425   :  { %v478_v32 = vpop.permute.xlu1 %477 }
 0x426   :  { %v483_v33 = vrot.slane %v478_v32, %v388_v11 }
 0x428   :  { %766 = vrcp.f32 %v483_v33 }
 0x429   :  { %v405_v35 = vpop.permute.xlu1 %404 }
 0x42a   :  { %v410_v36 = vrot.slane %v405_v35, %v388_v11 }
 0x42c   :  { %v411_v37 = vmul.f32 %v410_v36, %v401_v34 }
 0x42e   :  { %v461_v38 = vadd.f32 %v455_v28, %v411_v37 }
 0x430   :  { %463 = vst.msk [vmem:[#allocation4] sm:$0x1] %vm24_vm6, %v461_v38 }
 0x435   :  { %v767_v39 = vpop.eup %766 }
 0x437   :  { %v473_v40 = vld [vmem:[#allocation4] sm:$0x1] }
 0x438   :  { %v485_v41 = vmul.f32 %v767_v39, %v473_v40 }
 0x43a   :  { %v486_v42 = vpack.c.bf16 %v485_v41, %v485_v41 }
 0x43c   :  { %709 = vmatmul.mubr.msk.bf16.vlgmr.msra.gmra.mxu0 %vm104_vm0, %v486_v42 }
 0x4fc   :  { %v536_v43 = vpop.f32.mrf.mxu0 }
 0x4fd   :  { %v537_v44 = vadd.f32 %v536_v43, %v472_v10 }
 0x4fe   :  { %v710_v45 = vpop.f32.mrf.mxu0 }
 0x4ff   :  { %542 = vst [vmem:[%s950_s3] sm:$0x1] %v537_v44 }
 0x500   :  { %v539_v46 = vpop.f32.mrf.mxu0 }
 0x502   :  { %v711_v47 = vpop.f32.mrf.mxu0 }

</bundles_post_ra>
